<compile_context>
chip_gen: v7x
topology: tpu7x:2x2x1
jax: 0.10.0
libtpu: 0.0.40
codegen_flags: <defaults>
</compile_context>

<pallas_src>
import functools

import jax
import jax.numpy as jnp
from jax.experimental import pallas as pl
from jax.experimental.pallas import tpu as pltpu

QMIN = 0.0
QMAX = 255.0  # quint8

_LANE = 128
_TARGET_BLOCK_ELEMS = 512 * 1024  # ~2 MiB of f32 per array per grid step
_MIN_GRID_STEPS = 4               # v7x: 2 TCs -> want >= 2 (ideally 4) steps
_VMEM_LIMIT_BYTES = 32 * 1024 * 1024


def _make_add_relu_kernel(l_scale, l_zp, r_scale, r_zp, out_scale, out_zp):
    l_scale = float(l_scale)
    r_scale = float(r_scale)
    out_scale = float(out_scale)
    # Reciprocal multiplies instead of divides (VALU mul; divides would add EUP/VPU work).
    # NOTE: x * (1/s) vs x / s can flip round-half-to-even at exact .5 boundaries -> at
    # most a one-quant-level difference vs bit-exact PyTorch; acknowledged by tolerance.
    l_inv = 1.0 / l_scale
    r_inv = 1.0 / r_scale
    out_inv = 1.0 / out_scale
    # Fold the requant divide into the per-input dequant scales:
    #   relu(ql*l_s + qr*r_s) / out_s == relu(ql*(l_s/out_s) + qr*(r_s/out_s))
    l_scl = l_scale * out_inv
    r_scl = r_scale * out_inv
    # Fold integer zero-points into the clip bounds:
    #   (clip(round(x/s) + zp, 0, 255) - zp) == clip(round(x/s), -zp, 255 - zp)
    l_lo, l_hi = QMIN - float(l_zp), QMAX - float(l_zp)
    r_lo, r_hi = QMIN - float(r_zp), QMAX - float(r_zp)
    o_hi = QMAX - float(out_zp)
    # Lower output clip dropped: post-ReLU the rounded value is >= 0 >= -(out_zp) since
    # out_zp is quint8 (asserted in the wrapper). Not valid for a signed-int8 variant.

    def kernel(l_ref, r_ref, o_ref):
        l = l_ref[...].astype(jnp.float32)  # quant math always in f32, even for bf16 in
        r = r_ref[...].astype(jnp.float32)
        ql = jnp.clip(jnp.round(l * l_inv), l_lo, l_hi)    # quantize (zp folded)
        qr = jnp.clip(jnp.round(r * r_inv), r_lo, r_hi)
        t = jnp.maximum(ql * l_scl + qr * r_scl, 0.0)      # dequant + add + relu, /out_s folded
        o_ref[...] = (jnp.minimum(jnp.round(t), o_hi) * out_scale).astype(o_ref.dtype)

    return kernel


def _choose_lane_width(n):
    """Widest lane-dense last dim that divides numel (prefer enough rows for a multi-step
    grid). Returns None when numel is not a multiple of 128 -> flat 1-D ragged path."""
    widths = (8192, 4096, 2048, 1024, 512, 256, 128)
    divisors = [w for w in widths if n % w == 0]
    if not divisors:
        return None
    for min_rows in (32, 8):
        for w in divisors:
            if n // w >= min_rows:
                return w
    return divisors[0]


def _choose_block_rows(rows, w):
    """Block row count: ~_TARGET_BLOCK_ELEMS per block, multiple of 8, but capped so the
    grid keeps >= min(_MIN_GRID_STEPS, rows//8) steps (both v7x TCs busy, DMA overlap)."""
    if rows <= 8:
        return rows  # full-extent block on the row axis
    target = max(8, (_TARGET_BLOCK_ELEMS // w) // 8 * 8)
    steps = max(1, min(_MIN_GRID_STEPS, rows // 8))
    per_step = (rows + steps - 1) // steps
    cap = max(8, ((per_step + 7) // 8) * 8)
    return min(target, cap, (rows // 8) * 8)


@functools.partial(
    jax.jit,
    static_argnames=("l_scale", "l_zp", "r_scale", "r_zp", "out_scale", "out_zp"),
)
def quantized_add_relu(left, right, *, l_scale, l_zp, r_scale, r_zp, out_scale, out_zp):
    assert left.shape == right.shape, "add_relu requires matching shapes"
    # quint8 invariant needed for dropping the lower output clip in the kernel.
    assert 0 <= out_zp <= 255, "output zero_point must be quint8 (0..255)"
    orig_shape = left.shape
    out_dtype = left.dtype
    n = left.size

    kernel = _make_add_relu_kernel(l_scale, l_zp, r_scale, r_zp, out_scale, out_zp)
    cparams = pltpu.CompilerParams(
        dimension_semantics=("parallel",),
        vmem_limit_bytes=_VMEM_LIMIT_BYTES,  # covers v5e's 16 MiB default scoped VMEM
    )
    # NOTE: pipeline_mode=pl.Buffered(3) on the inputs is a possible small win on v7x;
    # left at the default depth since it needs trace verification to keep.

    lf = left.reshape(-1)
    rf = right.reshape(-1)

    w = _choose_lane_width(n)
    if w is None:
        # numel not a multiple of 128: stream the flat array directly; Pallas masks the
        # out-of-bounds tail of the last (ragged) block, so no pad/slice HBM round trip.
        block_n = n if n < _LANE else min(_TARGET_BLOCK_ELEMS, (n // _LANE) * _LANE)
        out_flat = pl.pallas_call(
            kernel,
            out_shape=jax.ShapeDtypeStruct((n,), out_dtype),
            grid=(pl.cdiv(n, block_n),),
            in_specs=[
                pl.BlockSpec((block_n,), lambda i: (i,)),
                pl.BlockSpec((block_n,), lambda i: (i,)),
            ],
            out_specs=pl.BlockSpec((block_n,), lambda i: (i,)),
            compiler_params=cparams,
        )(lf, rf)
        return out_flat.reshape(orig_shape)

    rows = n // w
    l2 = lf.reshape(rows, w)
    r2 = rf.reshape(rows, w)
    block_rows = _choose_block_rows(rows, w)

    out2d = pl.pallas_call(
        kernel,
        out_shape=jax.ShapeDtypeStruct((rows, w), out_dtype),
        grid=(pl.cdiv(rows, block_rows),),
        in_specs=[
            pl.BlockSpec((block_rows, w), lambda i: (i, 0)),
            pl.BlockSpec((block_rows, w), lambda i: (i, 0)),
        ],
        out_specs=pl.BlockSpec((block_rows, w), lambda i: (i, 0)),
        compiler_params=cparams,
    )(l2, r2)
    return out2d.reshape(orig_shape)


def _reference(left, right, l_scale, l_zp, r_scale, r_zp, out_scale, out_zp):
    """Pure-JAX reference of the PyTorch quantized add_relu + dequantize (divide-based)."""
    ql = jnp.clip(jnp.round(left / l_scale) + l_zp, QMIN, QMAX)
    qr = jnp.clip(jnp.round(right / r_scale) + r_zp, QMIN, QMAX)
    s = jnp.maximum((ql - l_zp) * l_scale + (qr - r_zp) * r_scale, 0.0)
    qo = jnp.clip(jnp.round(s / out_scale) + out_zp, QMIN, QMAX)
    return (qo - out_zp) * out_scale


if __name__ == "__main__":
    # Deterministic module "parameters" (quantization configs).
    l_scale, l_zp = 0.05, 128
    r_scale, r_zp = 0.03, 120
    out_scale, out_zp = 0.08, 100

    key = jax.random.PRNGKey(0)
    k1, k2 = jax.random.split(key)
    shape = (2, 4, 16, 16)  # NCHW, like the PyTorch test
    left = jax.random.uniform(k1, shape, jnp.float32, minval=-3.0, maxval=3.0)
    right = jax.random.uniform(k2, shape, jnp.float32, minval=-3.0, maxval=3.0)

    out = quantized_add_relu(
        left,
        right,
        l_scale=l_scale,
        l_zp=l_zp,
        r_scale=r_scale,
        r_zp=r_zp,
        out_scale=out_scale,
        out_zp=out_zp,
    )
    out = jax.block_until_ready(out)

    ref = _reference(left, right, l_scale, l_zp, r_scale, r_zp, out_scale, out_zp)
    assert out.shape == shape and out.dtype == jnp.float32

    # Quantized-op tolerance: reciprocal-multiply / folded-scale rounding may land on the
    # adjacent quant level vs the divide-based PyTorch semantics at exact .5 boundaries,
    # so the semantically meaningful bound is one output quantization step.
    max_err = float(jnp.max(jnp.abs(out - ref)))
    assert max_err <= out_scale + 1e-5, f"mismatch vs reference: max_err={max_err}"

    print("KERNEL_OK")
</pallas_src>

<mosaic_0001>
module attributes {stable_mosaic.version = 11 : i64} {
  func.func @kernel(%arg0: i32, %arg1: memref<8x256xf32, #tpu.memory_space<vmem>>, %arg2: memref<8x256xf32, #tpu.memory_space<vmem>>, %arg3: memref<8x256xf32, #tpu.memory_space<vmem>>) attributes {dimension_semantics = [#tpu.dimension_semantics<parallel>], iteration_bounds = array<i64: 1>, scalar_prefetch = 0 : i64, scratch_operands = 0 : i64, tpu.core_type = #tpu.core_type<tc>, window_params = [{transform_indices = @transform_0, window_bounds = array<i64: 8, 256>}, {transform_indices = @transform_1, window_bounds = array<i64: 8, 256>}, {transform_indices = @transform_2, window_bounds = array<i64: 8, 256>}]} {
    %c0 = arith.constant 0 : index
    %c0_0 = arith.constant 0 : index
    %0 = vector.load %arg1[%c0, %c0_0] : memref<8x256xf32, #tpu.memory_space<vmem>>, vector<8x256xf32>
    %c0_1 = arith.constant 0 : index
    %c0_2 = arith.constant 0 : index
    %1 = vector.load %arg2[%c0_1, %c0_2] : memref<8x256xf32, #tpu.memory_space<vmem>>, vector<8x256xf32>
    %cst = arith.constant 2.000000e+01 : f32
    %2 = vector.broadcast %cst : f32 to vector<8x256xf32>
    %3 = arith.mulf %0, %2 : vector<8x256xf32>
    %4 = math.roundeven %3 : vector<8x256xf32>
    %cst_3 = arith.constant -1.280000e+02 : f32
    %cst_4 = arith.constant 1.270000e+02 : f32
    %5 = vector.broadcast %cst_3 : f32 to vector<8x256xf32>
    %6 = arith.maximumf %5, %4 : vector<8x256xf32>
    %7 = vector.broadcast %cst_4 : f32 to vector<8x256xf32>
    %8 = arith.minimumf %7, %6 : vector<8x256xf32>
    %cst_5 = arith.constant 33.3333321 : f32
    %9 = vector.broadcast %cst_5 : f32 to vector<8x256xf32>
    %10 = arith.mulf %1, %9 : vector<8x256xf32>
    %11 = math.roundeven %10 : vector<8x256xf32>
    %cst_6 = arith.constant -1.200000e+02 : f32
    %cst_7 = arith.constant 1.350000e+02 : f32
    %12 = vector.broadcast %cst_6 : f32 to vector<8x256xf32>
    %13 = arith.maximumf %12, %11 : vector<8x256xf32>
    %14 = vector.broadcast %cst_7 : f32 to vector<8x256xf32>
    %15 = arith.minimumf %14, %13 : vector<8x256xf32>
    %cst_8 = arith.constant 6.250000e-01 : f32
    %16 = vector.broadcast %cst_8 : f32 to vector<8x256xf32>
    %17 = arith.mulf %8, %16 : vector<8x256xf32>
    %cst_9 = arith.constant 3.750000e-01 : f32
    %18 = vector.broadcast %cst_9 : f32 to vector<8x256xf32>
    %19 = arith.mulf %15, %18 : vector<8x256xf32>
    %20 = arith.addf %17, %19 : vector<8x256xf32>
    %cst_10 = arith.constant 0.000000e+00 : f32
    %21 = vector.broadcast %cst_10 : f32 to vector<8x256xf32>
    %22 = arith.maximumf %20, %21 : vector<8x256xf32>
    %23 = math.roundeven %22 : vector<8x256xf32>
    %cst_11 = arith.constant 1.550000e+02 : f32
    %24 = vector.broadcast %cst_11 : f32 to vector<8x256xf32>
    %25 = arith.minimumf %23, %24 : vector<8x256xf32>
    %cst_12 = arith.constant 8.000000e-02 : f32
    %26 = vector.broadcast %cst_12 : f32 to vector<8x256xf32>
    %27 = arith.mulf %25, %26 : vector<8x256xf32>
    %c0_13 = arith.constant 0 : index
    %c0_14 = arith.constant 0 : index
    %28 = vector.load %arg3[%c0_13, %c0_14] : memref<8x256xf32, #tpu.memory_space<vmem>>, vector<8x256xf32>
    tpu.vector_store %arg3[%c0_13, %c0_14], %27 {strides = array<i32>} : memref<8x256xf32, #tpu.memory_space<vmem>>, vector<8x256xf32>,
    return
  }
  func.func @transform_0(%arg0: i32) -> (i32, i32) {
    %c0_i32 = arith.constant 0 : i32
    %c0_i32_0 = arith.constant 0 : i32
    return %arg0, %c0_i32 : i32, i32
  }
  func.func @transform_1(%arg0: i32) -> (i32, i32) {
    %c0_i32 = arith.constant 0 : i32
    %c0_i32_0 = arith.constant 0 : i32
    return %arg0, %c0_i32 : i32, i32
  }
  func.func @transform_2(%arg0: i32) -> (i32, i32) {
    %c0_i32 = arith.constant 0 : i32
    %c0_i32_0 = arith.constant 0 : i32
    return %arg0, %c0_i32 : i32, i32
  }
}

</mosaic_0001>

<bundles_post_ra>
// kernel: quantized_add_relu.1
= control target key start
LH: loop header
LB: loop body
LE: loop exit
PB: predicated region body
PF: predicated region fallthrough
CT: control target
= control target key end

     0   :  { %s90_s0 = inlined_call_operand.vmem [shape: f32[8,256], index: 0, kind: input, shape index: {}]   ;;  %s91_s1 = inlined_call_operand.vmem [shape: f32[8,256], index: 1, kind: input, shape index: {}]   ;;  %s92_s2 = inlined_call_operand.vmem [shape: f32[8,256], index: 2, kind: output, shape index: {}]  }
   0x1   :  { %v11_v0 = vld [vmem:[%s90_s0] sm:$0xff]  ;;  %v12_v2 = vld [vmem:[%s90_s0 + $0x8] sm:$0xff] }
   0x2   :  { %v13_v1 = vld [vmem:[%s91_s1] sm:$0xff]  ;;  %v15_v3 = vmul.f32 20.0, %v11_v0  ;;  %v14_v5 = vld [vmem:[%s91_s1 + $0x8] sm:$0xff]  ;;  %v16_v6 = vmul.f32 20.0, %v12_v2 }
   0x3   :  { %v23_v4 = vmul.f32 33.333332, %v13_v1  ;;  %v24_v7 = vmul.f32 33.333332, %v14_v5 }
   0x4   :  { %v51_v8 = vround.rtne.f32 %v15_v3  ;;  %v52_v10 = vround.rtne.f32 %v16_v6 }
   0x5   :  { %v53_v9 = vround.rtne.f32 %v23_v4  ;;  %v54_v11 = vround.rtne.f32 %v24_v7 }
   0x6   :  { %v19_v12 = vmax.f32 %v51_v8, -128.0  ;;  %v20_v14 = vmax.f32 %v52_v10, -128.0 }
   0x7   :  { %v27_v13 = vmax.f32 %v53_v9, -120.0  ;;  %v28_v15 = vmax.f32 %v54_v11, -120.0 }
   0x8   :  { %v21_v16 = vmin.f32 %v19_v12, 127.0  ;;  %v22_v18 = vmin.f32 %v20_v14, 127.0 }
   0x9   :  { %v29_v17 = vmin.f32 %v27_v13, 135.0  ;;  %v30_v19 = vmin.f32 %v28_v15, 135.0 }
   0xa   :  { %v31_v20 = vmul.f32 0.625, %v21_v16  ;;  %v32_v22 = vmul.f32 0.625, %v22_v18 }
   0xb   :  { %v33_v21 = vmul.f32 0.375, %v29_v17  ;;  %v34_v23 = vmul.f32 0.375, %v30_v19 }
   0xd   :  { %v35_v24 = vadd.f32 %v33_v21, %v31_v20  ;;  %v36_v25 = vadd.f32 %v34_v23, %v32_v22 }
   0xf   :  { %v37_v26 = vmax.f32 %v35_v24, 0.0  ;;  %v38_v27 = vmax.f32 %v36_v25, 0.0 }
  0x11   :  { %v55_v28 = vround.rtne.f32 %v37_v26  ;;  %v56_v29 = vround.rtne.f32 %v38_v27 }
  0x13   :  { %v41_v30 = vmin.f32 %v55_v28, 155.0  ;;  %v42_v31 = vmin.f32 %v56_v29, 155.0 }
  0x15   :  { %v43_v32 = vmul.f32 0.08, %v41_v30  ;;  %v44_v33 = vmul.f32 0.08, %v42_v31 }
  0x17   :  { %45 = vst [vmem:[%s92_s2] sm:$0xff] %v43_v32  ;;  %46 = vst [vmem:[%s92_s2 + $0x8] sm:$0xff] %v44_v33 }

</bundles_post_ra>
